<compile_context>
chip_gen: v7x
topology: tpu7x:2x2x1
jax: 0.10.0
libtpu: 0.0.40
codegen_flags: <defaults>
</compile_context>

<pallas_src>
import jax
import jax.numpy as jnp
from jax.experimental import pallas as pl
from jax.experimental.pallas import tpu as pltpu

EPS = 1e-5


# ---------------------------------------------------------------------------
# One-time parameter packing (pure layout plumbing, done once per parameter set).
# ---------------------------------------------------------------------------
def pack_conv3x3_weight(w_hwio, w_spatial):
    """(3, 3, Cin, Cout) -> (3, W*Cin, W*Cout): one block-tridiagonal band per ky.

    Band ky, row (w_in*Cin + ci), col (w_out*Cout + co) holds w[ky, w_in - w_out + 1, ci, co]
    when |w_in - w_out| <= 1, else 0 — this folds both the W-direction shift and the zero
    'same' padding in W into the weight.
    """
    kh, kw, cin, cout = w_hwio.shape
    assert kh == 3 and kw == 3
    kx = jnp.arange(w_spatial)[:, None] - jnp.arange(w_spatial)[None, :] + 1  # (w_in, w_out)
    valid = (kx >= 0) & (kx < kw)
    kxc = jnp.clip(kx, 0, kw - 1)
    wpk = w_hwio[:, kxc, :, :]                                   # (3, Win, Wout, Cin, Cout)
    wpk = jnp.where(valid[None, :, :, None, None], wpk, 0.0)
    wpk = jnp.transpose(wpk, (0, 1, 3, 2, 4))                    # (ky, Win, Cin, Wout, Cout)
    return wpk.reshape(kh, w_spatial * cin, w_spatial * cout)


def pack_block_params(params, W, mxu_dtype=jnp.bfloat16):
    """Pack conv weights into per-ky band matrices, tile gamma/beta lane-dense, and build the
    channel-pooling matrix (hoisted out of the kernel)."""
    C = params["w1"].shape[2]
    WC = W * C
    lane_ch = jnp.arange(WC) % C
    # (s @ pool)[j] = sum over lanes i with channel(i) == channel(j) of s[i]  (scaled by 1/NPIX
    # inside the kernel) -> per-channel reduction over W-groups AND rebroadcast per lane in
    # one small matmul, with no lane<->sublane relayouts.
    pool = (lane_ch[:, None] == lane_ch[None, :]).astype(jnp.float32)        # (WC, WC)
    return dict(
        w1=pack_conv3x3_weight(params["w1"], W).astype(mxu_dtype),           # (3, WC, WC)
        w2=pack_conv3x3_weight(params["w2"], W).astype(mxu_dtype),
        g1=jnp.tile(params["g1"].reshape(1, C), (1, W)).astype(jnp.float32), # (1, WC)
        b1=jnp.tile(params["b1"].reshape(1, C), (1, W)).astype(jnp.float32),
        g2=jnp.tile(params["g2"].reshape(1, C), (1, W)).astype(jnp.float32),
        b2=jnp.tile(params["b2"].reshape(1, C), (1, W)).astype(jnp.float32),
        pool=pool,
        C=C, W=W,
    )


# ---------------------------------------------------------------------------
# Model-boundary layout converters (call once per model, NOT once per block).
# ---------------------------------------------------------------------------
def nchw_to_slab(x_nchw, dtype=jnp.bfloat16):
    B, C, H, W = x_nchw.shape
    return jnp.transpose(x_nchw, (0, 2, 3, 1)).reshape(B, H, W * C).astype(dtype)


def slab_to_nchw(x_slab, C):
    B, H, WC = x_slab.shape
    return jnp.transpose(x_slab.reshape(B, H, WC // C, C), (0, 3, 1, 2))


# ---------------------------------------------------------------------------
# Fused kernel: conv3x3 -> BN -> ReLU -> conv3x3 -> BN -> (+identity) -> ReLU.
# ---------------------------------------------------------------------------
def make_block_kernel(B, H, W, C):
    WC = W * C
    inv_npix = 1.0 / float(B * H * W)

    def kernel(x_ref, w1_ref, g1_ref, b1_ref, w2_ref, g2_ref, b2_ref, pool_ref, o_ref):
        f32 = jnp.float32
        mxu = x_ref.dtype                              # bf16 on the hot path, f32 on check path
        x2 = x_ref[...].reshape(B * H, WC)             # lane-dense activation slab (MXU dtype)
        pool = pool_ref[...]                           # (WC, WC) f32, prebuilt in wrapper
        zrow = jnp.zeros((B, 1, WC), f32)              # zero 'same' padding row for H

        def conv3x3(lhs, w_ref):
            # Three K=WC band matmuls off ONE unshifted LHS; the H-shift and H zero-padding
            # are applied to the f32 results (no 3xWC tap slab, no shifted copies of the
            # packed-dtype operand).  f32 accumulate on the MXU.
            yt = jnp.dot(lhs, w_ref[0], preferred_element_type=f32).reshape(B, H, WC)
            ym = jnp.dot(lhs, w_ref[1], preferred_element_type=f32).reshape(B, H, WC)
            yb = jnp.dot(lhs, w_ref[2], preferred_element_type=f32).reshape(B, H, WC)
            out = (ym
                   + jnp.concatenate([zrow, yt[:, :H - 1, :]], axis=1)   # row h-1 -> out row h
                   + jnp.concatenate([yb[:, 1:, :], zrow], axis=1))      # row h+1 -> out row h
            return out.reshape(B * H, WC)                                # (B*H, WC) f32

        def batchnorm(y, g_ref, b_ref):
            # Single-pass batch stats: per-lane sums over rows, then one pooling matmul gives
            # per-channel mean / E[y^2] already rebroadcast to the lane layout.
            s = jnp.sum(y, axis=0, keepdims=True)                        # (1, WC)
            ss = jnp.sum(y * y, axis=0, keepdims=True)                   # (1, WC)
            red = jnp.dot(jnp.concatenate([s, ss], axis=0), pool,
                          preferred_element_type=f32) * inv_npix         # (2, WC)
            mean = red[0:1, :]
            var = red[1:2, :] - mean * mean                              # biased variance
            scale = jax.lax.rsqrt(var + EPS) * g_ref[...]                # (1, WC)
            shift = b_ref[...] - mean * scale
            return y * scale + shift

        h1 = jnp.maximum(batchnorm(conv3x3(x2, w1_ref), g1_ref, b1_ref), 0.0)
        y2 = batchnorm(conv3x3(h1.astype(mxu), w2_ref), g2_ref, b2_ref)  # one cast per conv
        out = jnp.maximum(y2 + x2.astype(f32), 0.0)                      # residual + relu (f32)
        o_ref[...] = out.reshape(B, H, WC).astype(o_ref.dtype)           # single lane-dense store

    return kernel


def block_forward_slab(x_slab, packed):
    """Lane-dense (B, H, W*C) slab in / out.  The slab dtype selects the MXU-operand and I/O
    dtype (bf16 = hot path, f32 = exact path); BN/residual math is f32 inside regardless."""
    B, H, WC = x_slab.shape
    C, W = packed["C"], packed["W"]
    assert WC == W * C
    kernel = make_block_kernel(B, H, W, C)
    vmem = pl.BlockSpec(memory_space=pltpu.MemorySpace.VMEM)
    return pl.pallas_call(
        kernel,
        out_shape=jax.ShapeDtypeStruct((B, H, WC), x_slab.dtype),
        in_specs=[vmem] * 8,
        out_specs=vmem,
        # Explicit, v7x-safe VMEM budget (this toy-size kernel uses far less).
        compiler_params=pltpu.CompilerParams(vmem_limit_bytes=32 * 1024 * 1024),
    )(x_slab, packed["w1"], packed["g1"], packed["b1"],
      packed["w2"], packed["g2"], packed["b2"], packed["pool"])


# ---------------- pure-JAX reference (for correctness check) ----------------
def block_reference(x_nchw, params):
    x = jnp.transpose(x_nchw, (0, 2, 3, 1))

    def conv(h, w):
        return jax.lax.conv_general_dilated(
            h, w, window_strides=(1, 1), padding="SAME",
            dimension_numbers=("NHWC", "HWIO", "NHWC"))

    def bn(h, g, b):
        m = jnp.mean(h, axis=(0, 1, 2), keepdims=True)
        v = jnp.mean(jnp.square(h - m), axis=(0, 1, 2), keepdims=True)
        return (h - m) * jax.lax.rsqrt(v + EPS) * g.reshape(1, 1, 1, -1) + b.reshape(1, 1, 1, -1)

    h = jax.nn.relu(bn(conv(x, params["w1"]), params["g1"], params["b1"]))
    h = bn(conv(h, params["w2"]), params["g2"], params["b2"])
    return jnp.transpose(jax.nn.relu(h + x), (0, 3, 1, 2))


if __name__ == "__main__":
    # Small shapes consistent with the module: inplanes == planes (identity shortcut), stride=1.
    # W*C = 16*8 = 128 -> exactly one lane-dense vreg row per (b, h).
    B, C, H, W = 2, 8, 16, 16

    key = jax.random.PRNGKey(0)
    kx_, kw1, kw2, kg1, kb1, kg2, kb2 = jax.random.split(key, 7)

    x = jax.random.normal(kx_, (B, C, H, W), dtype=jnp.float32)          # NCHW like PyTorch

    params = {
        # conv weights stored as (KH, KW, Cin, Cout)  (PyTorch would be (Cout, Cin, KH, KW))
        "w1": 0.1 * jax.random.normal(kw1, (3, 3, C, C), dtype=jnp.float32),
        "w2": 0.1 * jax.random.normal(kw2, (3, 3, C, C), dtype=jnp.float32),
        "g1": 1.0 + 0.1 * jax.random.normal(kg1, (C,), dtype=jnp.float32),
        "b1": 0.1 * jax.random.normal(kb1, (C,), dtype=jnp.float32),
        "g2": 1.0 + 0.1 * jax.random.normal(kg2, (C,), dtype=jnp.float32),
        "b2": 0.1 * jax.random.normal(kb2, (C,), dtype=jnp.float32),
    }

    ref = jax.block_until_ready(block_reference(x, params))

    # Exact-semantics path (f32 operands and I/O): tight check against the reference.
    packed_f32 = pack_block_params(params, W, mxu_dtype=jnp.float32)
    out_slab_f32 = jax.block_until_ready(
        block_forward_slab(nchw_to_slab(x, jnp.float32), packed_f32))
    out_f32 = slab_to_nchw(out_slab_f32, C)
    assert out_f32.shape == (B, C, H, W)
    assert jnp.allclose(out_f32, ref, rtol=1e-4, atol=1e-4), \
        float(jnp.max(jnp.abs(out_f32 - ref)))

    # Hot path: bf16 activation I/O + bf16 MXU operands, f32 BN stats / residual inside.
    # bf16 I/O rounds the input (also the residual) and the output -> loose tolerance.
    packed_bf16 = pack_block_params(params, W, mxu_dtype=jnp.bfloat16)
    out_slab_bf16 = jax.block_until_ready(
        block_forward_slab(nchw_to_slab(x, jnp.bfloat16), packed_bf16))
    out_bf16 = slab_to_nchw(out_slab_bf16, C).astype(jnp.float32)
    assert out_bf16.shape == (B, C, H, W)
    assert jnp.allclose(out_bf16, ref, rtol=5e-2, atol=5e-2), \
        float(jnp.max(jnp.abs(out_bf16 - ref)))

    print("KERNEL_OK")
</pallas_src>

<mosaic_0001>
module attributes {stable_mosaic.version = 11 : i64} {
  func.func @kernel(%arg0: memref<2x16x128xf32, #tpu.memory_space<vmem>>, %arg1: memref<3x128x128xf32, #tpu.memory_space<vmem>>, %arg2: memref<1x128xf32, #tpu.memory_space<vmem>>, %arg3: memref<1x128xf32, #tpu.memory_space<vmem>>, %arg4: memref<3x128x128xf32, #tpu.memory_space<vmem>>, %arg5: memref<1x128xf32, #tpu.memory_space<vmem>>, %arg6: memref<1x128xf32, #tpu.memory_space<vmem>>, %arg7: memref<128x128xf32, #tpu.memory_space<vmem>>, %arg8: memref<2x16x128xf32, #tpu.memory_space<vmem>>) attributes {dimension_semantics = [], scalar_prefetch = 0 : i64, scratch_operands = 0 : i64, tpu.core_type = #tpu.core_type<tc>} {
    %c0 = arith.constant 0 : index
    %c0_0 = arith.constant 0 : index
    %c0_1 = arith.constant 0 : index
    %0 = vector.load %arg0[%c0, %c0_0, %c0_1] : memref<2x16x128xf32, #tpu.memory_space<vmem>>, vector<2x16x128xf32>
    %1 = vector.shape_cast %0 : vector<2x16x128xf32> to vector<32x128xf32>
    %c0_2 = arith.constant 0 : index
    %c0_3 = arith.constant 0 : index
    %2 = vector.load %arg7[%c0_2, %c0_3] : memref<128x128xf32, #tpu.memory_space<vmem>>, vector<128x128xf32>
    %cst = arith.constant 0.000000e+00 : f32
    %3 = vector.broadcast %cst : f32 to vector<2x1x128xf32>
    %c0_4 = arith.constant 0 : index
    %c0_5 = arith.constant 0 : index
    %c0_6 = arith.constant 0 : index
    %4 = vector.load %arg1[%c0_4, %c0_5, %c0_6] : memref<3x128x128xf32, #tpu.memory_space<vmem>>, vector<1x128x128xf32>
    %5 = vector.shape_cast %4 : vector<1x128x128xf32> to vector<128x128xf32>
    %cst_7 = arith.constant dense<0.000000e+00> : vector<32x128xf32>
    %6 = tpu.matmul %1, %5, %cst_7 {dimension_numbers = #tpu.dot_dimension_numbers<[1], [0], [0], [1], [0, 0, 1, 1], [], []>} : vector<32x128xf32>, vector<128x128xf32>, vector<32x128xf32> -> vector<32x128xf32>
    %7 = vector.shape_cast %6 : vector<32x128xf32> to vector<2x16x128xf32>
    %c1 = arith.constant 1 : index
    %c0_8 = arith.constant 0 : index
    %c0_9 = arith.constant 0 : index
    %8 = vector.load %arg1[%c1, %c0_8, %c0_9] : memref<3x128x128xf32, #tpu.memory_space<vmem>>, vector<1x128x128xf32>
    %9 = vector.shape_cast %8 : vector<1x128x128xf32> to vector<128x128xf32>
    %cst_10 = arith.constant dense<0.000000e+00> : vector<32x128xf32>
    %10 = tpu.matmul %1, %9, %cst_10 {dimension_numbers = #tpu.dot_dimension_numbers<[1], [0], [0], [1], [0, 0, 1, 1], [], []>} : vector<32x128xf32>, vector<128x128xf32>, vector<32x128xf32> -> vector<32x128xf32>
    %11 = vector.shape_cast %10 : vector<32x128xf32> to vector<2x16x128xf32>
    %c2 = arith.constant 2 : index
    %c0_11 = arith.constant 0 : index
    %c0_12 = arith.constant 0 : index
    %12 = vector.load %arg1[%c2, %c0_11, %c0_12] : memref<3x128x128xf32, #tpu.memory_space<vmem>>, vector<1x128x128xf32>
    %13 = vector.shape_cast %12 : vector<1x128x128xf32> to vector<128x128xf32>
    %cst_13 = arith.constant dense<0.000000e+00> : vector<32x128xf32>
    %14 = tpu.matmul %1, %13, %cst_13 {dimension_numbers = #tpu.dot_dimension_numbers<[1], [0], [0], [1], [0, 0, 1, 1], [], []>} : vector<32x128xf32>, vector<128x128xf32>, vector<32x128xf32> -> vector<32x128xf32>
    %15 = vector.shape_cast %14 : vector<32x128xf32> to vector<2x16x128xf32>
    %16 = vector.extract_strided_slice %7 {offsets = [0, 0, 0], sizes = [2, 15, 128], strides = [1, 1, 1]} : vector<2x16x128xf32> to vector<2x15x128xf32>
    %17 = tpu.concatenate %3, %16 in 1 : vector<2x1x128xf32>, vector<2x15x128xf32> -> vector<2x16x128xf32>
    %18 = arith.addf %11, %17 : vector<2x16x128xf32>
    %19 = vector.extract_strided_slice %15 {offsets = [0, 1, 0], sizes = [2, 15, 128], strides = [1, 1, 1]} : vector<2x16x128xf32> to vector<2x15x128xf32>
    %20 = tpu.concatenate %19, %3 in 1 : vector<2x15x128xf32>, vector<2x1x128xf32> -> vector<2x16x128xf32>
    %21 = arith.addf %18, %20 : vector<2x16x128xf32>
    %22 = vector.shape_cast %21 : vector<2x16x128xf32> to vector<32x128xf32>
    %cst_14 = arith.constant dense<0.000000e+00> : vector<128xf32>
    %23 = vector.multi_reduction <add>, %22, %cst_14 [0] : vector<32x128xf32> to vector<128xf32>
    %24 = vector.shape_cast %23 : vector<128xf32> to vector<1x128xf32>
    %25 = arith.mulf %22, %22 : vector<32x128xf32>
    %cst_15 = arith.constant dense<0.000000e+00> : vector<128xf32>
    %26 = vector.multi_reduction <add>, %25, %cst_15 [0] : vector<32x128xf32> to vector<128xf32>
    %27 = vector.shape_cast %26 : vector<128xf32> to vector<1x128xf32>
    %28 = tpu.concatenate %24, %27 in 0 : vector<1x128xf32>, vector<1x128xf32> -> vector<2x128xf32>
    %cst_16 = arith.constant dense<0.000000e+00> : vector<2x128xf32>
    %29 = tpu.matmul %28, %2, %cst_16 {dimension_numbers = #tpu.dot_dimension_numbers<[1], [0], [0], [1], [0, 0, 1, 1], [], []>} : vector<2x128xf32>, vector<128x128xf32>, vector<2x128xf32> -> vector<2x128xf32>
    %cst_17 = arith.constant 0.001953125 : f32
    %30 = vector.broadcast %cst_17 : f32 to vector<2x128xf32>
    %31 = arith.mulf %29, %30 : vector<2x128xf32>
    %32 = vector.extract_strided_slice %31 {offsets = [0, 0], sizes = [1, 128], strides = [1, 1]} : vector<2x128xf32> to vector<1x128xf32>
    %33 = vector.extract_strided_slice %31 {offsets = [1, 0], sizes = [1, 128], strides = [1, 1]} : vector<2x128xf32> to vector<1x128xf32>
    %34 = arith.mulf %32, %32 : vector<1x128xf32>
    %35 = arith.subf %33, %34 : vector<1x128xf32>
    %cst_18 = arith.constant 9.99999974E-6 : f32
    %36 = vector.broadcast %cst_18 : f32 to vector<1x128xf32>
    %37 = arith.addf %35, %36 : vector<1x128xf32>
    %38 = math.rsqrt %37 : vector<1x128xf32>
    %c0_19 = arith.constant 0 : index
    %c0_20 = arith.constant 0 : index
    %39 = vector.load %arg2[%c0_19, %c0_20] : memref<1x128xf32, #tpu.memory_space<vmem>>, vector<1x128xf32>
    %40 = arith.mulf %38, %39 : vector<1x128xf32>
    %c0_21 = arith.constant 0 : index
    %c0_22 = arith.constant 0 : index
    %41 = vector.load %arg3[%c0_21, %c0_22] : memref<1x128xf32, #tpu.memory_space<vmem>>, vector<1x128xf32>
    %42 = arith.mulf %32, %40 : vector<1x128xf32>
    %43 = arith.subf %41, %42 : vector<1x128xf32>
    %44 = vector.broadcast %40 : vector<1x128xf32> to vector<32x128xf32>
    %45 = arith.mulf %22, %44 : vector<32x128xf32>
    %46 = vector.broadcast %43 : vector<1x128xf32> to vector<32x128xf32>
    %47 = arith.addf %45, %46 : vector<32x128xf32>
    %cst_23 = arith.constant 0.000000e+00 : f32
    %48 = vector.broadcast %cst_23 : f32 to vector<32x128xf32>
    %49 = arith.maximumf %47, %48 : vector<32x128xf32>
    %c0_24 = arith.constant 0 : index
    %c0_25 = arith.constant 0 : index
    %c0_26 = arith.constant 0 : index
    %50 = vector.load %arg4[%c0_24, %c0_25, %c0_26] : memref<3x128x128xf32, #tpu.memory_space<vmem>>, vector<1x128x128xf32>
    %51 = vector.shape_cast %50 : vector<1x128x128xf32> to vector<128x128xf32>
    %cst_27 = arith.constant dense<0.000000e+00> : vector<32x128xf32>
    %52 = tpu.matmul %49, %51, %cst_27 {dimension_numbers = #tpu.dot_dimension_numbers<[1], [0], [0], [1], [0, 0, 1, 1], [], []>} : vector<32x128xf32>, vector<128x128xf32>, vector<32x128xf32> -> vector<32x128xf32>
    %53 = vector.shape_cast %52 : vector<32x128xf32> to vector<2x16x128xf32>
    %c1_28 = arith.constant 1 : index
    %c0_29 = arith.constant 0 : index
    %c0_30 = arith.constant 0 : index
    %54 = vector.load %arg4[%c1_28, %c0_29, %c0_30] : memref<3x128x128xf32, #tpu.memory_space<vmem>>, vector<1x128x128xf32>
    %55 = vector.shape_cast %54 : vector<1x128x128xf32> to vector<128x128xf32>
    %cst_31 = arith.constant dense<0.000000e+00> : vector<32x128xf32>
    %56 = tpu.matmul %49, %55, %cst_31 {dimension_numbers = #tpu.dot_dimension_numbers<[1], [0], [0], [1], [0, 0, 1, 1], [], []>} : vector<32x128xf32>, vector<128x128xf32>, vector<32x128xf32> -> vector<32x128xf32>
    %57 = vector.shape_cast %56 : vector<32x128xf32> to vector<2x16x128xf32>
    %c2_32 = arith.constant 2 : index
    %c0_33 = arith.constant 0 : index
    %c0_34 = arith.constant 0 : index
    %58 = vector.load %arg4[%c2_32, %c0_33, %c0_34] : memref<3x128x128xf32, #tpu.memory_space<vmem>>, vector<1x128x128xf32>
    %59 = vector.shape_cast %58 : vector<1x128x128xf32> to vector<128x128xf32>
    %cst_35 = arith.constant dense<0.000000e+00> : vector<32x128xf32>
    %60 = tpu.matmul %49, %59, %cst_35 {dimension_numbers = #tpu.dot_dimension_numbers<[1], [0], [0], [1], [0, 0, 1, 1], [], []>} : vector<32x128xf32>, vector<128x128xf32>, vector<32x128xf32> -> vector<32x128xf32>
    %61 = vector.shape_cast %60 : vector<32x128xf32> to vector<2x16x128xf32>
    %62 = vector.extract_strided_slice %53 {offsets = [0, 0, 0], sizes = [2, 15, 128], strides = [1, 1, 1]} : vector<2x16x128xf32> to vector<2x15x128xf32>
    %63 = tpu.concatenate %3, %62 in 1 : vector<2x1x128xf32>, vector<2x15x128xf32> -> vector<2x16x128xf32>
    %64 = arith.addf %57, %63 : vector<2x16x128xf32>
    %65 = vector.extract_strided_slice %61 {offsets = [0, 1, 0], sizes = [2, 15, 128], strides = [1, 1, 1]} : vector<2x16x128xf32> to vector<2x15x128xf32>
    %66 = tpu.concatenate %65, %3 in 1 : vector<2x15x128xf32>, vector<2x1x128xf32> -> vector<2x16x128xf32>
    %67 = arith.addf %64, %66 : vector<2x16x128xf32>
    %68 = vector.shape_cast %67 : vector<2x16x128xf32> to vector<32x128xf32>
    %cst_36 = arith.constant dense<0.000000e+00> : vector<128xf32>
    %69 = vector.multi_reduction <add>, %68, %cst_36 [0] : vector<32x128xf32> to vector<128xf32>
    %70 = vector.shape_cast %69 : vector<128xf32> to vector<1x128xf32>
    %71 = arith.mulf %68, %68 : vector<32x128xf32>
    %cst_37 = arith.constant dense<0.000000e+00> : vector<128xf32>
    %72 = vector.multi_reduction <add>, %71, %cst_37 [0] : vector<32x128xf32> to vector<128xf32>
    %73 = vector.shape_cast %72 : vector<128xf32> to vector<1x128xf32>
    %74 = tpu.concatenate %70, %73 in 0 : vector<1x128xf32>, vector<1x128xf32> -> vector<2x128xf32>
    %cst_38 = arith.constant dense<0.000000e+00> : vector<2x128xf32>
    %75 = tpu.matmul %74, %2, %cst_38 {dimension_numbers = #tpu.dot_dimension_numbers<[1], [0], [0], [1], [0, 0, 1, 1], [], []>} : vector<2x128xf32>, vector<128x128xf32>, vector<2x128xf32> -> vector<2x128xf32>
    %cst_39 = arith.constant 0.001953125 : f32
    %76 = vector.broadcast %cst_39 : f32 to vector<2x128xf32>
    %77 = arith.mulf %75, %76 : vector<2x128xf32>
    %78 = vector.extract_strided_slice %77 {offsets = [0, 0], sizes = [1, 128], strides = [1, 1]} : vector<2x128xf32> to vector<1x128xf32>
    %79 = vector.extract_strided_slice %77 {offsets = [1, 0], sizes = [1, 128], strides = [1, 1]} : vector<2x128xf32> to vector<1x128xf32>
    %80 = arith.mulf %78, %78 : vector<1x128xf32>
    %81 = arith.subf %79, %80 : vector<1x128xf32>
    %cst_40 = arith.constant 9.99999974E-6 : f32
    %82 = vector.broadcast %cst_40 : f32 to vector<1x128xf32>
    %83 = arith.addf %81, %82 : vector<1x128xf32>
    %84 = math.rsqrt %83 : vector<1x128xf32>
    %c0_41 = arith.constant 0 : index
    %c0_42 = arith.constant 0 : index
    %85 = vector.load %arg5[%c0_41, %c0_42] : memref<1x128xf32, #tpu.memory_space<vmem>>, vector<1x128xf32>
    %86 = arith.mulf %84, %85 : vector<1x128xf32>
    %c0_43 = arith.constant 0 : index
    %c0_44 = arith.constant 0 : index
    %87 = vector.load %arg6[%c0_43, %c0_44] : memref<1x128xf32, #tpu.memory_space<vmem>>, vector<1x128xf32>
    %88 = arith.mulf %78, %86 : vector<1x128xf32>
    %89 = arith.subf %87, %88 : vector<1x128xf32>
    %90 = vector.broadcast %86 : vector<1x128xf32> to vector<32x128xf32>
    %91 = arith.mulf %68, %90 : vector<32x128xf32>
    %92 = vector.broadcast %89 : vector<1x128xf32> to vector<32x128xf32>
    %93 = arith.addf %91, %92 : vector<32x128xf32>
    %94 = arith.addf %93, %1 : vector<32x128xf32>
    %cst_45 = arith.constant 0.000000e+00 : f32
    %95 = vector.broadcast %cst_45 : f32 to vector<32x128xf32>
    %96 = arith.maximumf %94, %95 : vector<32x128xf32>
    %97 = vector.shape_cast %96 : vector<32x128xf32> to vector<2x16x128xf32>
    %c0_46 = arith.constant 0 : index
    %c0_47 = arith.constant 0 : index
    %c0_48 = arith.constant 0 : index
    %98 = vector.load %arg8[%c0_46, %c0_47, %c0_48] : memref<2x16x128xf32, #tpu.memory_space<vmem>>, vector<2x16x128xf32>
    tpu.vector_store %arg8[%c0_46, %c0_47, %c0_48], %97 {strides = array<i32>} : memref<2x16x128xf32, #tpu.memory_space<vmem>>, vector<2x16x128xf32>,
    return
  }
}

</mosaic_0001>

<bundles_post_ra>
// kernel: tpu_custom_call.1
= control target key start
LH: loop header
LB: loop body
LE: loop exit
PB: predicated region body
PF: predicated region fallthrough
CT: control target
= control target key end

     0   :  { %13 = vsyncpa [#allocation3], 0  ;;  %s2210_s0 = inlined_call_operand.hbm [shape: f32[2,16,128], index: 0, kind: input, shape index: {}]   ;;  %s2211_s1 = inlined_call_operand.hbm [shape: f32[3,128,128], index: 1, kind: input, shape index: {}]   ;;  %s2212_s2 = inlined_call_operand.vmem [shape: f32[1,128], index: 2, kind: input, shape index: {}]   ;;  %s2213_s3 = inlined_call_operand.vmem [shape: f32[1,128], index: 3, kind: input, shape index: {}]   ;;  %s2214_s4 = inlined_call_operand.hbm [shape: f32[3,128,128], index: 4, kind: input, shape index: {}]   ;;  %s2215_s5 = inlined_call_operand.vmem [shape: f32[1,128], index: 5, kind: input, shape index: {}]   ;;  %s2216_s6 = inlined_call_operand.vmem [shape: f32[1,128], index: 6, kind: input, shape index: {}]   ;;  %s2217_s7 = inlined_call_operand.hbm [shape: f32[128,128], index: 7, kind: input, shape index: {}]   ;;  %s2218_s8 = inlined_call_operand.hbm [shape: f32[2,16,128], index: 8, kind: output, shape index: {}]  }
   0x1   :  { %14 = vsyncpa [#allocation6], 0 }
   0x2   :  { %15 = vsyncpa [#allocation9], 0 }
   0x3   :  { %16 = vsyncpa [#allocation4], 0  ;;  %s1924_s27 = smov [#allocation5]   ;;  %s1925_s29 = smov [#allocation2]  }
   0x4   :  { %s34_s28 = sshll.u32 %s1924_s27, 4  ;;  %s22_s30 = sshll.u32 %s1925_s29, 4  ;;  %s35_s28 = int_to_ptr.vmem [resolvable:$true] %s34_s28  ;;  %s1979_s30 = int_to_ptr.vmem [resolvable:$true] %s22_s30 }
   0x5   :  { %s1806_s11 = scalar_lea.hbm %s2211_s1, 6144 }
   0x6   :  { %p1807_p0 = scmp.ne.s32.totalorder %s2211_s1, %s1806_s11  ;;  %p1810_p1 = scmp.lt.u32.totalorder %s1806_s11, %s2211_s1 }
   0x8   :  { %p1812_p2 = pnand %p1810_p1, %p1807_p0 }
   0xa   :  { %1815 = shalt.err (!%p1812_p2)
}
   0xb   :  { %s1816_s16 = scalar_lea.vmem %s35_s28, 6144  ;;  %p1821_p4 = scmp.lt.s32.totalorder %s35_s28, %s35_s28 }
   0xc   :  { %p1817_p3 = scmp.ne.s32.totalorder %s35_s28, %s1816_s16  ;;  %p1822_p5 = scmp.lt.s32.totalorder %s1816_s16, %s1816_s16 }
   0xe   :  { %p1823_p6 = por %p1822_p5, %p1821_p4 }
  0x10   :  { %p1824_p7 = pnand %p1823_p6, %p1817_p3 }
  0x12   :  { %1827 = shalt.err (!%p1824_p7)
}
  0x13   :  { %s1926_s17 = smov 128   ;;  %s1927_s18 = smov 8  }
  0x14   :  { %40 = dma.hbm_to_vmem [thread:$0]  %s2211_s1, 6144, %s35_s28, [#allocation6], %s1926_s17, %s1926_s17, %s1927_s18  }
  0x15   :  { %s1828_s23 = scalar_lea.hbm %s2210_s0, 512 }
  0x16   :  { %p1829_p8 = scmp.ne.s32.totalorder %s2210_s0, %s1828_s23  ;;  %p1832_p9 = scmp.lt.u32.totalorder %s1828_s23, %s2210_s0 }
  0x18   :  { %p1834_p10 = pnand %p1832_p9, %p1829_p8 }
  0x1a   :  { %1837 = shalt.err (!%p1834_p10)
}
  0x1b   :  { %s1838_s29 = scalar_lea.vmem %s1979_s30, 512  ;;  %p1843_p12 = scmp.lt.s32.totalorder %s1979_s30, %s1979_s30 }
  0x1c   :  { %p1839_p11 = scmp.ne.s32.totalorder %s1979_s30, %s1838_s29  ;;  %p1844_p13 = scmp.lt.s32.totalorder %s1838_s29, %s1838_s29 }
  0x1e   :  { %p1845_p0 = por %p1844_p13, %p1843_p12 }
  0x20   :  { %p1846_p1 = pnand %p1845_p0, %p1839_p11 }
  0x22   :  { %1849 = shalt.err (!%p1846_p1)
}
  0x23   :  { %28 = dma.hbm_to_vmem [thread:$0]  %s2210_s0, 512, %s1979_s30, [#allocation3], %s1926_s17, %s1926_s17, %s1927_s18  }
  0x24   :  { %s1928_s9 = smov [#allocation7]   ;;  %s1929_s11 = smov [#allocation8]  }
  0x25   :  { %s50_s10 = sshll.u32 %s1928_s9, 4  ;;  %s66_s12 = sshll.u32 %s1929_s11, 4  ;;  %s51_s10 = int_to_ptr.vmem [resolvable:$true] %s50_s10  ;;  %s2016_s12 = int_to_ptr.vmem [resolvable:$true] %s66_s12 }
  0x26   :  { %s1850_s15 = scalar_lea.hbm %s2214_s4, 6144 }
  0x27   :  { %p1851_p2 = scmp.ne.s32.totalorder %s2214_s4, %s1850_s15  ;;  %p1854_p3 = scmp.lt.u32.totalorder %s1850_s15, %s2214_s4 }
  0x29   :  { %p1856_p4 = pnand %p1854_p3, %p1851_p2 }
  0x2b   :  { %1859 = shalt.err (!%p1856_p4)
}
  0x2c   :  { %s1860_s0 = scalar_lea.vmem %s51_s10, 6144  ;;  %p1865_p6 = scmp.lt.s32.totalorder %s51_s10, %s51_s10 }
  0x2d   :  { %p1861_p5 = scmp.ne.s32.totalorder %s51_s10, %s1860_s0  ;;  %p1866_p7 = scmp.lt.s32.totalorder %s1860_s0, %s1860_s0 }
  0x2f   :  { %p1867_p8 = por %p1866_p7, %p1865_p6 }
  0x31   :  { %p1868_p9 = pnand %p1867_p8, %p1861_p5 }
  0x33   :  { %1871 = shalt.err (!%p1868_p9)
}
  0x34   :  { %56 = dma.hbm_to_vmem [thread:$0]  %s2214_s4, 6144, %s51_s10, [#allocation6], %s1926_s17, %s1926_s17, %s1927_s18  }
  0x35   :  { %s1872_s25 = scalar_lea.hbm %s2217_s7, 2048 }
  0x36   :  { %p1873_p10 = scmp.ne.s32.totalorder %s2217_s7, %s1872_s25  ;;  %p1876_p11 = scmp.lt.u32.totalorder %s1872_s25, %s2217_s7 }
  0x38   :  { %p1878_p12 = pnand %p1876_p11, %p1873_p10 }
  0x3a   :  { %1881 = shalt.err (!%p1878_p12)
}
  0x3b   :  { %s1882_s28 = scalar_lea.vmem %s2016_s12, 2048  ;;  %p1887_p0 = scmp.lt.s32.totalorder %s2016_s12, %s2016_s12 }
  0x3c   :  { %p1883_p13 = scmp.ne.s32.totalorder %s2016_s12, %s1882_s28  ;;  %p1888_p1 = scmp.lt.s32.totalorder %s1882_s28, %s1882_s28 }
  0x3e   :  { %p1889_p2 = por %p1888_p1, %p1887_p0 }
  0x40   :  { %p1890_p3 = pnand %p1889_p2, %p1883_p13 }
  0x42   :  { %1893 = shalt.err (!%p1890_p3)
}
  0x43   :  { %72 = dma.hbm_to_vmem [thread:$0]  %s2217_s7, 2048, %s2016_s12, [#allocation9], %s1926_s17, %s1926_s17, %s1927_s18  }
  0x44   :  { %1916 = dma.done.wait [#allocation3], 512  }
  0x45   :  { %1917 = vsyncadd [#allocation3], 4294966784 }
  0x46   :  { %1918 = dma.done.wait [#allocation6], 12288  }
  0x47   :  { %1919 = vsyncadd [#allocation6], 4294955008 }
  0x48   :  { %1920 = dma.done.wait [#allocation9], 2048  }
  0x49   :  { %1921 = vsyncadd [#allocation9], 4294965248  ;;  %v105_v0 = vld [vmem:[#allocation5] sm:$0xff]  ;;  %v106_v1 = vld [vmem:[#allocation5 + $0x8] sm:$0xff]  ;;  %vm1931_vm0 = vmmov 0   ;;  %vm414_vm1 = vcmask 1040384  }
  0x4a   :  { %v207_v2 = vld [vmem:[#allocation5 + $0x80] sm:$0xff]  ;;  %v1552_v3 = vpack.c.bf16 %v106_v1, %v105_v0  ;;  %v208_v4 = vld [vmem:[#allocation5 + $0x88] sm:$0xff]  ;;  %v107_v5 = vld [vmem:[#allocation5 + $0x10] sm:$0xff]  ;;  %vm435_vm2 = vcmask 1046528  }
  0x4b   :  { %v108_v6 = vld [vmem:[#allocation5 + $0x18] sm:$0xff]  ;;  %v1584_v7 = vpack.c.bf16 %v208_v4, %v207_v2  ;;  %v209_v9 = vld [vmem:[#allocation5 + $0x90] sm:$0xff]  ;;  %v109_v11 = vld [vmem:[#allocation5 + $0x20] sm:$0xff] }
  0x4c   :  { %v1556_v8 = vpack.c.bf16 %v108_v6, %v107_v5  ;;  %v210_v10 = vld [vmem:[#allocation5 + $0x98] sm:$0xff]  ;;  %1553 = vmatprep.subr.bf16.mxu0 %v1552_v3  ;;  %v110_v13 = vld [vmem:[#allocation5 + $0x28] sm:$0xff]  ;;  %v211_v14 = vld [vmem:[#allocation5 + $0xa0] sm:$0xff] }
  0x4d   :  { %v1588_v12 = vpack.c.bf16 %v210_v10, %v209_v9  ;;  %v212_v15 = vld [vmem:[#allocation5 + $0xa8] sm:$0xff]  ;;  %1555 = vmatpush3.bf16.msra.mxu0 %v1552_v3  ;;  %1585 = vmatprep.subr.bf16.mxu1 %v1584_v7  ;;  %v1560_v16 = vpack.c.bf16 %v110_v13, %v109_v11  ;;  %v111_v18 = vld [vmem:[#allocation5 + $0x30] sm:$0xff]  ;;  %v112_v19 = vld [vmem:[#allocation5 + $0x38] sm:$0xff] }
  0x4e   :  { %1557 = vmatprep.subr.bf16.mxu0 %v1556_v8  ;;  %1587 = vmatpush3.bf16.msra.mxu1 %v1584_v7  ;;  %v1592_v17 = vpack.c.bf16 %v212_v15, %v211_v14  ;;  %v213_v20 = vld [vmem:[#allocation5 + $0xb0] sm:$0xff]  ;;  %v214_v21 = vld [vmem:[#allocation5 + $0xb8] sm:$0xff]  ;;  %v1564_v22 = vpack.c.bf16 %v112_v19, %v111_v18  ;;  %v113_v24 = vld [vmem:[#allocation5 + $0x40] sm:$0xff]  ;;  %v1930_v14 = vmov 0.0|0.0  }
  0x4f   :  { %1589 = vmatprep.subr.bf16.mxu1 %v1588_v12  ;;  %v1596_v23 = vpack.c.bf16 %v214_v21, %v213_v20  ;;  %v114_v25 = vld [vmem:[#allocation5 + $0x48] sm:$0xff]  ;;  %v2053_v26 = vld [vmem:[#allocation2] sm:$0xff]  ;;  %v115_v31 = vld [vmem:[#allocation5 + $0x50] sm:$0xff] }
  0x50   :  { %v215_v27 = vld [vmem:[#allocation5 + $0xc0] sm:$0xff]  ;;  %v216_v28 = vld [vmem:[#allocation5 + $0xc8] sm:$0xff]  ;;  %1286 = vmatprep.mubr.f32.mxu0 %v2053_v26  ;;  %1324 = vmatprep.mubr.f32.mxu1 %v2053_v26  ;;  %v1568_v29 = vpack.c.bf16 %v114_v25, %v113_v24  ;;  %v116_v32 = vld [vmem:[#allocation5 + $0x58] sm:$0xff] }
  0x51   :  { %1559 = vmatpush3.bf16.msra.mxu0 %v1556_v8  ;;  %v1600_v30 = vpack.c.bf16 %v216_v28, %v215_v27  ;;  %v217_v33 = vld [vmem:[#allocation5 + $0xd0] sm:$0xff]  ;;  %v218_v34 = vld [vmem:[#allocation5 + $0xd8] sm:$0xff]  ;;  %v1572_v35 = vpack.c.bf16 %v116_v32, %v115_v31  ;;  %v117_v37 = vld [vmem:[#allocation5 + $0x60] sm:$0xff] }
  0x52   :  { %1561 = vmatprep.subr.bf16.mxu0 %v1560_v16  ;;  %1591 = vmatpush3.bf16.msra.mxu1 %v1588_v12  ;;  %v1604_v36 = vpack.c.bf16 %v218_v34, %v217_v33  ;;  %v118_v38 = vld [vmem:[#allocation5 + $0x68] sm:$0xff]  ;;  %v219_v39 = vld [vmem:[#allocation5 + $0xe0] sm:$0xff]  ;;  %v119_v43 = vld [vmem:[#allocation5 + $0x70] sm:$0xff]  ;;  %v1932_v34 = vmov 0.0  }
  0x53   :  { %1593 = vmatprep.subr.bf16.mxu1 %v1592_v17  ;;  %v220_v40 = vld [vmem:[#allocation5 + $0xe8] sm:$0xff]  ;;  %v1576_v41 = vpack.c.bf16 %v118_v38, %v117_v37  ;;  %v120_v44 = vld [vmem:[#allocation5 + $0x78] sm:$0xff]  ;;  %v221_v45 = vld [vmem:[#allocation5 + $0xf0] sm:$0xff] }
  0x54   :  { %v1608_v42 = vpack.c.bf16 %v220_v40, %v219_v39  ;;  %v222_v46 = vld [vmem:[#allocation5 + $0xf8] sm:$0xff]  ;;  %v1580_v47 = vpack.c.bf16 %v120_v44, %v119_v43  ;;  %v309_v49 = vld [vmem:[#allocation5 + $0x100] sm:$0xff]  ;;  %v310_v50 = vld [vmem:[#allocation5 + $0x108] sm:$0xff] }
  0x55   :  { %1563 = vmatpush3.bf16.msra.mxu0 %v1560_v16  ;;  %v1612_v48 = vpack.c.bf16 %v222_v46, %v221_v45  ;;  %v1616_v51 = vpack.c.bf16 %v310_v50, %v309_v49  ;;  %v311_v52 = vld [vmem:[#allocation5 + $0x110] sm:$0xff]  ;;  %v312_v53 = vld [vmem:[#allocation5 + $0x118] sm:$0xff]  ;;  %v2057_v54 = vld [vmem:[#allocation2 + $0x8] sm:$0xff] }
  0x56   :  { %1565 = vmatprep.subr.bf16.mxu0 %v1564_v22  ;;  %1595 = vmatpush3.bf16.msra.mxu1 %v1592_v17  ;;  %v1620_v55 = vpack.c.bf16 %v312_v53, %v311_v52  ;;  %v313_v56 = vld [vmem:[#allocation5 + $0x120] sm:$0xff]  ;;  %v314_v57 = vld [vmem:[#allocation5 + $0x128] sm:$0xff]  ;;  %v2059_v58 = vld [vmem:[#allocation2 + $0x10] sm:$0xff] }
  0x57   :  { %1597 = vmatprep.subr.bf16.mxu1 %v1596_v23  ;;  %v2063_v59 = vld [vmem:[#allocation2 + $0x18] sm:$0xff]  ;;  %v1624_v60 = vpack.c.bf16 %v314_v57, %v313_v56  ;;  %v315_v61 = vld [vmem:[#allocation5 + $0x130] sm:$0xff]  ;;  %v317_v0 = vld [vmem:[#allocation5 + $0x140] sm:$0xff] }
  0x58   :  { %v316_v62 = vld [vmem:[#allocation5 + $0x138] sm:$0xff]  ;;  %v318_v1 = vld [vmem:[#allocation5 + $0x148] sm:$0xff]  ;;  %v319_v3 = vld [vmem:[#allocation5 + $0x150] sm:$0xff] }
  0x59   :  { %1567 = vmatpush3.bf16.msra.mxu0 %v1564_v22  ;;  %v1628_v63 = vpack.c.bf16 %v316_v62, %v315_v61  ;;  %v1632_v2 = vpack.c.bf16 %v318_v1, %v317_v0  ;;  %v320_v4 = vld [vmem:[#allocation5 + $0x158] sm:$0xff]  ;;  %v321_v6 = vld [vmem:[#allocation5 + $0x160] sm:$0xff]  ;;  %v322_v7 = vld [vmem:[#allocation5 + $0x168] sm:$0xff] }
  0x5a   :  { %1569 = vmatprep.subr.bf16.mxu0 %v1568_v29  ;;  %1599 = vmatpush3.bf16.msra.mxu1 %v1596_v23  ;;  %v1636_v5 = vpack.c.bf16 %v320_v4, %v319_v3  ;;  %v1640_v8 = vpack.c.bf16 %v322_v7, %v321_v6  ;;  %v323_v9 = vld [vmem:[#allocation5 + $0x170] sm:$0xff]  ;;  %v324_v10 = vld [vmem:[#allocation5 + $0x178] sm:$0xff]  ;;  %v89_v12 = vld [vmem:[#allocation8] sm:$0xff] }
  0x5b   :  { %1601 = vmatprep.subr.bf16.mxu1 %v1600_v30  ;;  %v1644_v11 = vpack.c.bf16 %v324_v10, %v323_v9  ;;  %v90_v13 = vld [vmem:[#allocation8 + $0x8] sm:$0xff]  ;;  %v91_v16 = vld [vmem:[#allocation8 + $0x10] sm:$0xff]  ;;  %v92_v17 = vld [vmem:[#allocation8 + $0x18] sm:$0xff] }
  0x5c   :  { %v2074_v15 = vpack.c.bf16 %v90_v13, %v89_v12  ;;  %v2078_v18 = vpack.c.bf16 %v92_v17, %v91_v16  ;;  %v93_v19 = vld [vmem:[#allocation8 + $0x20] sm:$0xff]  ;;  %v94_v20 = vld [vmem:[#allocation8 + $0x28] sm:$0xff]  ;;  %v95_v22 = vld [vmem:[#allocation8 + $0x30] sm:$0xff] }
  0x5d   :  { %1571 = vmatpush3.bf16.msra.mxu0 %v1568_v29  ;;  %v2082_v21 = vpack.c.bf16 %v94_v20, %v93_v19  ;;  %v96_v23 = vld [vmem:[#allocation8 + $0x38] sm:$0xff]  ;;  %v97_v25 = vld [vmem:[#allocation8 + $0x40] sm:$0xff]  ;;  %v98_v27 = vld [vmem:[#allocation8 + $0x48] sm:$0xff] }
  0x5e   :  { %1573 = vmatprep.subr.bf16.mxu0 %v1572_v35  ;;  %1603 = vmatpush3.bf16.msra.mxu1 %v1600_v30  ;;  %v2086_v24 = vpack.c.bf16 %v96_v23, %v95_v22  ;;  %v2090_v28 = vpack.c.bf16 %v98_v27, %v97_v25  ;;  %v99_v29 = vld [vmem:[#allocation8 + $0x50] sm:$0xff]  ;;  %v100_v30 = vld [vmem:[#allocation8 + $0x58] sm:$0xff]  ;;  %v101_v32 = vld [vmem:[#allocation8 + $0x60] sm:$0xff] }
  0x5f   :  { %1605 = vmatprep.subr.bf16.mxu1 %v1604_v36  ;;  %v2094_v31 = vpack.c.bf16 %v100_v30, %v99_v29  ;;  %v102_v33 = vld [vmem:[#allocation8 + $0x68] sm:$0xff]  ;;  %v104_v37 = vld [vmem:[#allocation8 + $0x78] sm:$0xff] }
  0x61   :  { %1575 = vmatpush3.bf16.msra.mxu0 %v1572_v35  ;;  %v2099_v35 = vpack.c.bf16 %v102_v33, %v101_v32 }
  0x62   :  { %1577 = vmatprep.subr.bf16.mxu0 %v1576_v41  ;;  %1607 = vmatpush3.bf16.msra.mxu1 %v1604_v36  ;;  %v103_v36 = vld [vmem:[#allocation8 + $0x70] sm:$0xff] }
  0x63   :  { %1609 = vmatprep.subr.bf16.mxu1 %v1608_v42  ;;  %v2103_v38 = vpack.c.bf16 %v104_v37, %v103_v36 }
  0x65   :  { %1579 = vmatpush3.bf16.msra.mxu0 %v1576_v41 }
  0x66   :  { %1581 = vmatprep.subr.bf16.mxu0 %v1580_v47  ;;  %1611 = vmatpush3.bf16.msra.mxu1 %v1608_v42 }
  0x67   :  { %1613 = vmatprep.subr.bf16.mxu1 %v1612_v48 }
  0x69   :  { %1583 = vmatpush3.bf16.msra.mxu0 %v1580_v47 }
  0x6a   :  { %1615 = vmatpush3.bf16.msra.mxu1 %v1612_v48  ;;  %1617 = vmatprep.subr.bf16.mxu0 %v1616_v51 }
  0x6b   :  { %1648 = vmatprep.subr.bf16.mxu1 %v1930_v14 }
  0x6c   :  { %1287 = vmatmul.mubr.f32.vlgmr.msra.gmra.mrb[0].mxu0 %v2057_v54 }
  0x6d   :  { %1619 = vmatpush3.bf16.msra.mxu0 %v1616_v51  ;;  %1325 = vmatmul.mubr.f32.vlgmr.msra.gmra.mrb[0].mxu1 %v2057_v54 }
  0x6e   :  { %1621 = vmatprep.subr.bf16.mxu0 %v1620_v55  ;;  %1289 = vmatprep.mubr.f32.mxu0 %v2059_v58 }
  0x6f   :  { %1327 = vmatprep.mubr.f32.mxu1 %v2059_v58  ;;  %1650 = vmatpush3.bf16.msra.mxu1 %v2074_v15 }
  0x70   :  { %1290 = vmatmul.mubr.f32.gmra.mrb[2].mxu0 %v2063_v59  ;;  %1651 = vmatprep.subr.bf16.mxu1 %v1930_v14 }
  0x71   :  { %1623 = vmatpush3.bf16.msra.mxu0 %v1620_v55  ;;  %1328 = vmatmul.mubr.f32.gmra.mrb[2].mxu1 %v2063_v59 }
  0x72   :  { %1625 = vmatprep.subr.bf16.mxu0 %v1624_v60  ;;  %1362 = vmatprep.mubr.f32.mxu0 %v2053_v26 }
  0x73   :  { %1653 = vmatpush3.bf16.msra.mxu1 %v2078_v18  ;;  %1400 = vmatprep.mubr.msk.f32.mxu1 %vm1931_vm0, %v1932_v34 }
  0x74   :  { %1654 = vmatprep.subr.bf16.mxu1 %v1930_v14 }
  0x75   :  { %1627 = vmatpush3.bf16.msra.mxu0 %v1624_v60 }
  0x76   :  { %1629 = vmatprep.subr.bf16.mxu0 %v1628_v63 }
  0x77   :  { %1656 = vmatpush3.bf16.msra.mxu1 %v2082_v21 }
  0x78   :  { %1657 = vmatprep.subr.bf16.mxu1 %v1930_v14 }
  0x79   :  { %1631 = vmatpush3.bf16.msra.mxu0 %v1628_v63 }
  0x7a   :  { %1633 = vmatprep.subr.bf16.mxu0 %v1632_v2 }
  0x7b   :  { %1659 = vmatpush3.bf16.msra.mxu1 %v2086_v24 }
  0x7c   :  { %1660 = vmatprep.subr.bf16.mxu1 %v1930_v14 }
  0x7d   :  { %1635 = vmatpush3.bf16.msra.mxu0 %v1632_v2 }
  0x7e   :  { %1637 = vmatprep.subr.bf16.mxu0 %v1636_v5 }
  0x7f   :  { %1662 = vmatpush3.bf16.msra.mxu1 %v2090_v28 }
  0x80   :  { %1663 = vmatprep.subr.bf16.mxu1 %v1930_v14 }
  0x81   :  { %1639 = vmatpush3.bf16.msra.mxu0 %v1636_v5 }
  0x82   :  { %1641 = vmatprep.subr.bf16.mxu0 %v1640_v8 }
  0x83   :  { %1665 = vmatpush3.bf16.msra.mxu1 %v2094_v31 }
  0x84   :  { %1666 = vmatprep.subr.bf16.mxu1 %v1930_v14 }
  0x85   :  { %1643 = vmatpush3.bf16.msra.mxu0 %v1640_v8 }
  0x86   :  { %1645 = vmatprep.subr.bf16.mxu0 %v1644_v11 }
  0x87   :  { %1668 = vmatpush3.bf16.msra.mxu1 %v2099_v35 }
  0x88   :  { %1669 = vmatprep.subr.bf16.mxu1 %v1930_v14 }
  0x89   :  { %1647 = vmatpush3.bf16.msra.mxu0 %v1644_v11 }
  0x8b   :  { %1671 = vmatpush3.bf16.msra.mxu1 %v2103_v38 }
  0x8c   :  { %1363 = vmatmul.mubr.f32.vlgmr.msra.gmra.mrb[4].mxu0 %v2057_v54 }
  0x8d   :  { %1365 = vmatprep.mubr.f32.mxu0 %v2059_v58 }
  0x90   :  { %1366 = vmatmul.mubr.f32.gmra.mrb[6].mxu0 %v2063_v59 }
 0x13f   :  { %v1288_v39 = vpop.f32.mrb[0].mxu0 }
 0x140   :  { %v416_v40 = vrot.slane %v1288_v39, 7  ;;  %v187_v41 = vpop.f32.mrb[1].mxu0  ;;  %v1326_v42 = vpop.f32.mrb[0].mxu1 }
 0x141   :  { %v415_v43 = vrot.slane %v187_v41, 7  ;;  %v289_v44 = vpop.f32.mrb[1].mxu1 }
 0x143   :  { %v417_v45 = vsel %vm414_vm1, %v415_v43, %v416_v40  ;;  %v425_v46 = vsel %vm414_vm1, 0.0, %v415_v43  ;;  %v1291_v47 = vpop.f32.mrb[2].mxu0 }
 0x144   :  { %v428_v48 = vadd.f32 %v1326_v42, %v417_v45  ;;  %v427_v49 = vadd.f32 %v425_v46, %v289_v44  ;;  %v419_v50 = vrot.slane %v1291_v47, 7  ;;  %v197_v51 = vpop.f32.mrb[3].mxu0  ;;  %v1329_v52 = vpop.f32.mrb[2].mxu1 }
 0x145   :  { %v418_v53 = vrot.slane %v197_v51, 7  ;;  %v299_v55 = vpop.f32.mrb[3].mxu1  ;;  %v691_v51 = vld [vmem:[#allocation7 + $0x80] sm:$0xff] }
 0x147   :  { %v420_v56 = vsel %vm414_vm1, %v418_v53, %v419_v50  ;;  %v426_v57 = vsel %vm414_vm1, 0.0, %v418_v53 }
 0x148   :  { %v430_v60 = vadd.f32 %v1329_v52, %v420_v56  ;;  %v429_v61 = vadd.f32 %v426_v57, %v299_v55  ;;  %v692_v52 = vld [vmem:[#allocation7 + $0x88] sm:$0xff]  ;;  %v591_v55 = vld [vmem:[#allocation7 + $0x10] sm:$0xff]  ;;  %v592_v56 = vld [vmem:[#allocation7 + $0x18] sm:$0xff] }
 0x149   :  { %v1704_v53 = vpack.c.bf16 %v692_v52, %v691_v51  ;;  %v1676_v57 = vpack.c.bf16 %v592_v56, %v591_v55  ;;  %v794_v51 = vld [vmem:[#allocation7 + $0x108] sm:$0xff] }
 0x14b   :  { %1705 = vmatprep.subr.bf16.mxu1 %v1704_v53 }
 0x15f   :  { %v1364_v62 = vpop.f32.mrb[4].mxu0 }
 0x160   :  { %v437_v63 = vrot.slane %v1364_v62, 1  ;;  %v391_v0 = vpop.f32.mrb[5].mxu0 }
 0x161   :  { %v436_v1 = vrot.slane %v391_v0, 1  ;;  %v594_v0 = vld [vmem:[#allocation7 + $0x28] sm:$0xff] }
 0x162   :  { %v446_v2 = vsel %vm435_vm2, %v437_v63, 0.0 }
 0x163   :  { %v2112_v3 = vadd.f32 %v446_v2, %v428_v48  ;;  %v438_v4 = vsel %vm435_vm2, %v436_v1, %v437_v63  ;;  %v1367_v5 = vpop.f32.mrb[6].mxu0  ;;  %v589_v48 = vld [vmem:[#allocation7] sm:$0xff] }
 0x164   :  { %v2115_v6 = vadd.f32 %v438_v4, %v427_v49  ;;  %v440_v7 = vrot.slane %v1367_v5, 1  ;;  %v401_v8 = vpop.f32.mrb[7].mxu0  ;;  %v590_v49 = vld [vmem:[#allocation7 + $0x8] sm:$0xff]  ;;  %v593_v63 = vld [vmem:[#allocation7 + $0x20] sm:$0xff] }
 0x165   :  { %v439_v9 = vrot.slane %v401_v8, 1  ;;  %v462_v10 = vmul.f32 %v2112_v3, %v2112_v3  ;;  %v1672_v50 = vpack.c.bf16 %v590_v49, %v589_v48  ;;  %v1680_v1 = vpack.c.bf16 %v594_v0, %v593_v63  ;;  %v695_v2 = vld [vmem:[#allocation7 + $0xa0] sm:$0xff]  ;;  %v696_v4 = vld [vmem:[#allocation7 + $0xa8] sm:$0xff]  ;;  %v596_v8 = vld [vmem:[#allocation7 + $0x38] sm:$0xff] }
 0x166   :  { %v461_v11 = vmul.f32 %v2115_v6, %v2115_v6  ;;  %v447_v12 = vsel %vm435_vm2, %v440_v7, 0.0  ;;  %v452_v17 = vadd.f32 %v2112_v3, %v2115_v6  ;;  %v1712_v5 = vpack.c.bf16 %v696_v4, %v695_v2  ;;  %v706_v48 = vld [vmem:[#allocation7 + $0xf8] sm:$0xff] }
 0x167   :  { %v2122_v13 = vadd.f32 %v447_v12, %v430_v60  ;;  %v441_v16 = vsel %vm435_vm2, %v439_v9, %v440_v7  ;;  %1673 = vmatprep.subr.bf16.mxu0 %v1672_v50  ;;  %v693_v60 = vld [vmem:[#allocation7 + $0x90] sm:$0xff]  ;;  %v567_v63 = vlaneseq }
 0x168   :  { %v2127_v19 = vadd.f32 %v441_v16, %v429_v61  ;;  %v465_v20 = vadd.f32 %v462_v10, %v461_v11  ;;  %1675 = vmatpush3.bf16.msra.mxu0 %v1672_v50  ;;  %v694_v61 = vld [vmem:[#allocation7 + $0x98] sm:$0xff]  ;;  %v595_v7 = vld [vmem:[#allocation7 + $0x30] sm:$0xff]  ;;  %v597_v16 = vld [vmem:[#allocation7 + $0x40] sm:$0xff] }
 0x169   :  { %v464_v25 = vmul.f32 %v2122_v13, %v2122_v13  ;;  %v1708_v62 = vpack.c.bf16 %v694_v61, %v693_v60  ;;  %1677 = vmatprep.subr.bf16.mxu0 %v1676_v57  ;;  %v1684_v9 = vpack.c.bf16 %v596_v8, %v595_v7  ;;  %v697_v10 = vld [vmem:[#allocation7 + $0xb0] sm:$0xff]  ;;  %v698_v11 = vld [vmem:[#allocation7 + $0xb8] sm:$0xff]  ;;  %v793_v50 = vld [vmem:[#allocation7 + $0x100] sm:$0xff]  ;;  %v2137_v0 = vshrl.u32 %v567_v63, 7 }
 0x16a   :  { %v453_v22 = vadd.f32 %v452_v17, %v2127_v19  ;;  %v463_v23 = vmul.f32 %v2127_v19, %v2127_v19  ;;  %v1716_v12 = vpack.c.bf16 %v698_v11, %v697_v10  ;;  %v598_v17 = vld [vmem:[#allocation7 + $0x48] sm:$0xff]  ;;  %v1736_v52 = vpack.c.bf16 %v794_v51, %v793_v50  ;;  %v561_v8 = vld [vmem:[%s2213_s3] sm:$0x1]  ;;  %v808_v51 = vld [vmem:[#allocation7 + $0x178] sm:$0xff] }
 0x16b   :  { %v578_v11 = vsub.s32 0, %v2137_v0  ;;  %v806_v50 = vld [vmem:[#allocation7 + $0x168] sm:$0xff] }
 0x16c   :  { %v454_v27 = vadd.f32 %v453_v22, %v2122_v13  ;;  %v466_v29 = vadd.f32 %v465_v20, %v463_v23  ;;  %1679 = vmatpush3.bf16.msra.mxu0 %v1676_v57  ;;  %v1688_v20 = vpack.c.bf16 %v598_v17, %v597_v16  ;;  %v699_v22 = vld [vmem:[#allocation7 + $0xc0] sm:$0xff]  ;;  %v700_v23 = vld [vmem:[#allocation7 + $0xc8] sm:$0xff] }
 0x16d   :  { %1681 = vmatprep.subr.bf16.mxu0 %v1680_v1 }
 0x16e   :  { %v455_v30 = vrot.slane %v454_v27, 4  ;;  %v467_v32 = vadd.f32 %v466_v29, %v464_v25  ;;  %v1720_v25 = vpack.c.bf16 %v700_v23, %v699_v22  ;;  %v600_v29 = vld [vmem:[#allocation7 + $0x58] sm:$0xff] }
 0x170   :  { %v456_v33 = vadd.f32 %v455_v30, %v454_v27  ;;  %v468_v36 = vrot.slane %v467_v32, 4  ;;  %1683 = vmatpush3.bf16.msra.mxu0 %v1680_v1  ;;  %v599_v27 = vld [vmem:[#allocation7 + $0x50] sm:$0xff]  ;;  %v1098_v1 = vld [vmem:[%s2212_s2] ss:$0 sm:$0xff] }
 0x171   :  { %1685 = vmatprep.subr.bf16.mxu0 %v1684_v9  ;;  %v1692_v30 = vpack.c.bf16 %v600_v29, %v599_v27  ;;  %v795_v29 = vld [vmem:[#allocation7 + $0x110] sm:$0xff] }
 0x172   :  { %v457_v37 = vrot.slane %v456_v33, 2  ;;  %v469_v39 = vadd.f32 %v468_v36, %v467_v32  ;;  %v701_v32 = vld [vmem:[#allocation7 + $0xd0] sm:$0xff] }
 0x174   :  { %v458_v40 = vadd.f32 %v457_v37, %v456_v33  ;;  %v470_v41 = vrot.slane %v469_v39, 2  ;;  %1687 = vmatpush3.bf16.msra.mxu0 %v1684_v9  ;;  %v702_v33 = vld [vmem:[#allocation7 + $0xd8] sm:$0xff]  ;;  %v601_v37 = vld [vmem:[#allocation7 + $0x60] sm:$0xff] }
 0x175   :  { %1689 = vmatprep.subr.bf16.mxu0 %v1688_v20  ;;  %v1724_v36 = vpack.c.bf16 %v702_v33, %v701_v32 }
 0x176   :  { %v459_v42 = vrot.slane %v458_v40, 1  ;;  %v471_v43 = vadd.f32 %v470_v41, %v469_v39  ;;  %v602_v39 = vld [vmem:[#allocation7 + $0x68] sm:$0xff]  ;;  %v703_v41 = vld [vmem:[#allocation7 + $0xe0] sm:$0xff] }
 0x178   :  { %v472_v44 = vrot.slane %v471_v43, 1  ;;  %v460_v45 = vadd.f32 %v459_v42, %v458_v40  ;;  %1691 = vmatpush3.bf16.msra.mxu0 %v1688_v20  ;;  %v1696_v40 = vpack.c.bf16 %v602_v39, %v601_v37  ;;  %v704_v42 = vld [vmem:[#allocation7 + $0xe8] sm:$0xff] }
 0x179   :  { %1693 = vmatprep.subr.bf16.mxu0 %v1692_v30 }
 0x17a   :  { %v473_v46 = vadd.f32 %v472_v44, %v471_v43  ;;  %v1728_v43 = vpack.c.bf16 %v704_v42, %v703_v41  ;;  %v603_v44 = vld [vmem:[#allocation7 + $0x70] sm:$0xff]  ;;  %v797_v41 = vld [vmem:[#allocation7 + $0x120] sm:$0xff] }
 0x17b   :  { %v799_v42 = vld [vmem:[#allocation7 + $0x130] sm:$0xff] }
 0x17c   :  { %v474_v47 = vsel %vm414_vm1, %v460_v45, %v473_v46  ;;  %1695 = vmatpush3.bf16.msra.mxu0 %v1692_v30  ;;  %v604_v45 = vld [vmem:[#allocation7 + $0x78] sm:$0xff] }
 0x17d   :  { %1401 = vmatmul.mubr.f32.vlgmr.msra.gmra.mrb[4].mxu1 %v474_v47  ;;  %1697 = vmatprep.subr.bf16.mxu0 %v1696_v40  ;;  %v1700_v46 = vpack.c.bf16 %v604_v45, %v603_v44  ;;  %v705_v47 = vld [vmem:[#allocation7 + $0xf0] sm:$0xff]  ;;  %v796_v30 = vld [vmem:[#allocation7 + $0x118] sm:$0xff]  ;;  %v801_v44 = vld [vmem:[#allocation7 + $0x140] sm:$0xff] }
 0x17e   :  { %1707 = vmatpush3.bf16.msra.mxu1 %v1704_v53  ;;  %v1732_v49 = vpack.c.bf16 %v706_v48, %v705_v47  ;;  %v1740_v37 = vpack.c.bf16 %v796_v30, %v795_v29  ;;  %v802_v45 = vld [vmem:[#allocation7 + $0x148] sm:$0xff]  ;;  %v804_v47 = vld [vmem:[#allocation7 + $0x158] sm:$0xff] }
 0x17f   :  { %1709 = vmatprep.subr.bf16.mxu1 %v1708_v62 }
 0x180   :  { %1699 = vmatpush3.bf16.msra.mxu0 %v1696_v40 }
 0x181   :  { %1701 = vmatprep.subr.bf16.mxu0 %v1700_v46 }
 0x182   :  { %1711 = vmatpush3.bf16.msra.mxu1 %v1708_v62 }
 0x183   :  { %1713 = vmatprep.subr.bf16.mxu1 %v1712_v5 }
 0x184   :  { %1703 = vmatpush3.bf16.msra.mxu0 %v1700_v46  ;;  %v803_v46 = vld [vmem:[#allocation7 + $0x150] sm:$0xff] }
 0x185   :  { %1737 = vmatprep.subr.bf16.mxu0 %v1736_v52  ;;  %v1756_v48 = vpack.c.bf16 %v804_v47, %v803_v46 }
 0x186   :  { %1715 = vmatpush3.bf16.msra.mxu1 %v1712_v5  ;;  %v569_v5 = vsub.s32 1, %v2137_v0 }
 0x187   :  { %1717 = vmatprep.subr.bf16.mxu1 %v1716_v12 }
 0x18a   :  { %1719 = vmatpush3.bf16.msra.mxu1 %v1716_v12 }
 0x18b   :  { %1721 = vmatprep.subr.bf16.mxu1 %v1720_v25 }
 0x18e   :  { %1723 = vmatpush3.bf16.msra.mxu1 %v1720_v25 }
 0x18f   :  { %1725 = vmatprep.subr.bf16.mxu1 %v1724_v36 }
 0x192   :  { %1727 = vmatpush3.bf16.msra.mxu1 %v1724_v36 }
 0x193   :  { %1729 = vmatprep.subr.bf16.mxu1 %v1728_v43 }
 0x196   :  { %1731 = vmatpush3.bf16.msra.mxu1 %v1728_v43  ;;  %v800_v43 = vld [vmem:[#allocation7 + $0x138] sm:$0xff] }
 0x197   :  { %1733 = vmatprep.subr.bf16.mxu1 %v1732_v49 }
 0x19a   :  { %1735 = vmatpush3.bf16.msra.mxu1 %v1732_v49  ;;  %v805_v49 = vld [vmem:[#allocation7 + $0x160] sm:$0xff] }
 0x19b   :  { %1768 = vmatprep.subr.bf16.mxu1 %v1930_v14 }
 0x250   :  { %v541_v53 = vpop.f32.mrb[4].mxu1 }
 0x251   :  { %v545_v55 = vmul.f32 0.001953125, %v541_v53  ;;  %v1402_v56 = vpop.f32.mrb[5].mxu1 }
 0x253   :  { %v546_v57 = vmul.f32 %v545_v55, %v545_v55 }
 0x255   :  { %v548_v60 = vrot.slane %v546_v57, 7 }
 0x257   :  { %v550_v61 = vsub.f32 %v545_v55, %v548_v60 }
 0x259   :  { %v551_v62 = vadd.f32 1e-05, %v550_v61 }
 0x25b   :  { %1802 = vrsqrt.f32 %v551_v62 }
 0x265   :  { %v1803_v2 = vpop.eup %1802 }
 0x266   :  { %v560_v4 = vmul.f32 %v1803_v2, %v1098_v1 }
 0x268   :  { %v563_v7 = vrot.slane %v560_v4, 1  ;;  %v570_v10 = vrot.slane %v560_v4, %v569_v5 }
 0x26a   :  { %v565_v9 = vmul.f32 %v563_v7, %v545_v55  ;;  %v571_v17 = vmul.f32 %v570_v10, %v2115_v6  ;;  %v572_v20 = vmul.f32 %v570_v10, %v2112_v3  ;;  %v573_v22 = vmul.f32 %v570_v10, %v2127_v19  ;;  %v798_v6 = vld [vmem:[#allocation7 + $0x128] sm:$0xff] }
 0x26b   :  { %v574_v32 = vmul.f32 %v570_v10, %v2122_v13  ;;  %v1744_v19 = vpack.c.bf16 %v798_v6, %v797_v41  ;;  %v1748_v13 = vpack.c.bf16 %v800_v43, %v799_v42 }
 0x26c   :  { %v566_v12 = vsub.f32 %v561_v8, %v565_v9 }
 0x26e   :  { %v579_v16 = vrot.slane %v566_v12, %v578_v11 }
 0x270   :  { %v581_v23 = vadd.f32 %v579_v16, %v571_v17  ;;  %v582_v25 = vadd.f32 %v579_v16, %v572_v20  ;;  %v583_v27 = vadd.f32 %v579_v16, %v573_v22  ;;  %v584_v39 = vadd.f32 %v579_v16, %v574_v32 }
 0x272   :  { %v585_v33 = vmax.f32 %v581_v23, 0.0  ;;  %v586_v36 = vmax.f32 %v582_v25, 0.0  ;;  %v587_v40 = vmax.f32 %v583_v27, 0.0  ;;  %v588_v3 = vmax.f32 %v584_v39, 0.0 }
 0x274   :  { %1435 = vmatprep.mubr.f32.mxu0 %v585_v33  ;;  %1473 = vmatprep.mubr.f32.mxu1 %v585_v33 }
 0x275   :  { %1436 = vmatmul.mubr.f32.vlgmr.msra.gmra.mrb[8].mxu0 %v586_v36  ;;  %1474 = vmatmul.mubr.f32.vlgmr.msra.gmra.mrb[6].mxu1 %v586_v36 }
 0x276   :  { %1739 = vmatpush3.bf16.msra.mxu0 %v1736_v52  ;;  %1438 = vmatprep.mubr.f32.mxu0 %v587_v40 }
 0x277   :  { %1476 = vmatprep.mubr.f32.mxu1 %v587_v40  ;;  %1741 = vmatprep.subr.bf16.mxu0 %v1740_v37 }
 0x278   :  { %1770 = vmatpush3.bf16.msra.mxu1 %v2074_v15  ;;  %v1752_v15 = vpack.c.bf16 %v802_v45, %v801_v44 }
 0x279   :  { %1439 = vmatmul.mubr.f32.gmra.mrb[10].mxu0 %v588_v3  ;;  %1477 = vmatmul.mubr.f32.gmra.mrb[8].mxu1 %v588_v3 }
 0x27a   :  { %1743 = vmatpush3.bf16.msra.mxu0 %v1740_v37  ;;  %1511 = vmatprep.mubr.f32.mxu0 %v585_v33 }
 0x27b   :  { %1745 = vmatprep.subr.bf16.mxu0 %v1744_v19  ;;  %1771 = vmatprep.subr.bf16.mxu1 %v1930_v14 }
 0x27c   :  { %1773 = vmatpush3.bf16.msra.mxu1 %v2078_v18  ;;  %1549 = vmatprep.mubr.msk.f32.mxu1 %vm1931_vm0, %v1932_v34  ;;  %v1760_v18 = vpack.c.bf16 %v806_v50, %v805_v49  ;;  %v807_v34 = vld [vmem:[#allocation7 + $0x170] sm:$0xff] }
 0x27d   :  { %1774 = vmatprep.subr.bf16.mxu1 %v1930_v14 }
 0x27e   :  { %1747 = vmatpush3.bf16.msra.mxu0 %v1744_v19 }
 0x27f   :  { %1749 = vmatprep.subr.bf16.mxu0 %v1748_v13 }
 0x280   :  { %1776 = vmatpush3.bf16.msra.mxu1 %v2082_v21  ;;  %v1764_v21 = vpack.c.bf16 %v808_v51, %v807_v34 }
 0x281   :  { %1777 = vmatprep.subr.bf16.mxu1 %v1930_v14 }
 0x282   :  { %1751 = vmatpush3.bf16.msra.mxu0 %v1748_v13 }
 0x283   :  { %1753 = vmatprep.subr.bf16.mxu0 %v1752_v15 }
 0x284   :  { %1779 = vmatpush3.bf16.msra.mxu1 %v2086_v24 }
 0x285   :  { %1780 = vmatprep.subr.bf16.mxu1 %v1930_v14 }
 0x286   :  { %1755 = vmatpush3.bf16.msra.mxu0 %v1752_v15 }
 0x287   :  { %1757 = vmatprep.subr.bf16.mxu0 %v1756_v48 }
 0x288   :  { %1782 = vmatpush3.bf16.msra.mxu1 %v2090_v28 }
 0x289   :  { %1783 = vmatprep.subr.bf16.mxu1 %v1930_v14 }
 0x28a   :  { %1759 = vmatpush3.bf16.msra.mxu0 %v1756_v48 }
 0x28b   :  { %1761 = vmatprep.subr.bf16.mxu0 %v1760_v18 }
 0x28c   :  { %1785 = vmatpush3.bf16.msra.mxu1 %v2094_v31 }
 0x28d   :  { %1786 = vmatprep.subr.bf16.mxu1 %v1930_v14 }
 0x28e   :  { %1763 = vmatpush3.bf16.msra.mxu0 %v1760_v18 }
 0x28f   :  { %1765 = vmatprep.subr.bf16.mxu0 %v1764_v21 }
 0x290   :  { %1788 = vmatpush3.bf16.msra.mxu1 %v2099_v35 }
 0x291   :  { %1789 = vmatprep.subr.bf16.mxu1 %v1930_v14 }
 0x292   :  { %1767 = vmatpush3.bf16.msra.mxu0 %v1764_v21 }
 0x294   :  { %1791 = vmatpush3.bf16.msra.mxu1 %v2103_v38 }
 0x295   :  { %1512 = vmatmul.mubr.f32.vlgmr.msra.gmra.mrb[12].mxu0 %v586_v36 }
 0x296   :  { %1514 = vmatprep.mubr.f32.mxu0 %v587_v40 }
 0x299   :  { %1515 = vmatmul.mubr.f32.gmra.mrb[14].mxu0 %v588_v3 }
 0x348   :  { %v1437_v24 = vpop.f32.mrb[8].mxu0  ;;  %v1475_v28 = vpop.f32.mrb[6].mxu1 }
 0x349   :  { %v899_v52 = vrot.slane %v1437_v24, 7  ;;  %v671_v53 = vpop.f32.mrb[9].mxu0  ;;  %v773_v55 = vpop.f32.mrb[7].mxu1 }
 0x34a   :  { %v898_v31 = vrot.slane %v671_v53, 7 }
 0x34c   :  { %v900_v56 = vsel %vm414_vm1, %v898_v31, %v899_v52  ;;  %v908_v57 = vsel %vm414_vm1, 0.0, %v898_v31  ;;  %v1440_v60 = vpop.f32.mrb[10].mxu0  ;;  %v1478_v35 = vpop.f32.mrb[8].mxu1 }
 0x34d   :  { %v910_v61 = vadd.f32 %v908_v57, %v773_v55  ;;  %v902_v14 = vrot.slane %v1440_v60, 7  ;;  %v681_v62 = vpop.f32.mrb[11].mxu0  ;;  %v783_v63 = vpop.f32.mrb[9].mxu1  ;;  %v911_v38 = vadd.f32 %v1475_v28, %v900_v56 }
 0x34e   :  { %v901_v1 = vrot.slane %v681_v62, 7 }
 0x350   :  { %v903_v2 = vsel %vm414_vm1, %v901_v1, %v902_v14  ;;  %v909_v4 = vsel %vm414_vm1, 0.0, %v901_v1 }
 0x351   :  { %v912_v7 = vadd.f32 %v909_v4, %v783_v63  ;;  %v913_v8 = vadd.f32 %v1478_v35, %v903_v2  ;;  %v1099_v35 = vld [vmem:[%s2215_s5] ss:$0 sm:$0xff]  ;;  %s1933_s5 = smov [#allocation10]  }
 0x352   :  { %v1043_v63 = vld [vmem:[%s2216_s6] sm:$0x1]  ;;  %s1084_s15 = sshll.u32 %s1933_s5, 4  ;;  %s1085_s15 = int_to_ptr.vmem [resolvable:$true] %s1084_s15 }
 0x353   :  { %s1894_s6 = scalar_lea.vmem %s1085_s15, 512  ;;  %p1899_p5 = scmp.lt.s32.totalorder %s1085_s15, %s1085_s15 }
 0x354   :  { %p1895_p4 = scmp.ne.s32.totalorder %s1085_s15, %s1894_s6  ;;  %p1900_p6 = scmp.lt.s32.totalorder %s1894_s6, %s1894_s6 }
 0x356   :  { %p1901_p7 = por %p1900_p6, %p1899_p5 }
 0x358   :  { %p1902_p8 = pnand %p1901_p7, %p1895_p4 }
 0x368   :  { %v1513_v9 = vpop.f32.mrb[12].mxu0 }
 0x369   :  { %v919_v10 = vrot.slane %v1513_v9, 1  ;;  %v875_v12 = vpop.f32.mrb[13].mxu0 }
 0x36a   :  { %v918_v16 = vrot.slane %v875_v12, 1 }
 0x36b   :  { %v928_v17 = vsel %vm435_vm2, %v919_v10, 0.0 }
 0x36c   :  { %v931_v20 = vadd.f32 %v928_v17, %v911_v38  ;;  %v920_v22 = vsel %vm435_vm2, %v918_v16, %v919_v10  ;;  %v1516_v23 = vpop.f32.mrb[14].mxu0 }
 0x36d   :  { %v930_v25 = vadd.f32 %v920_v22, %v910_v61  ;;  %v922_v27 = vrot.slane %v1516_v23, 1  ;;  %v885_v29 = vpop.f32.mrb[15].mxu0 }
 0x36e   :  { %v921_v30 = vrot.slane %v885_v29, 1  ;;  %v944_v32 = vmul.f32 %v931_v20, %v931_v20 }
 0x36f   :  { %v943_v33 = vmul.f32 %v930_v25, %v930_v25  ;;  %v929_v36 = vsel %vm435_vm2, %v922_v27, 0.0  ;;  %v934_v40 = vadd.f32 %v931_v20, %v930_v25 }
 0x370   :  { %v933_v37 = vadd.f32 %v929_v36, %v913_v8  ;;  %v923_v39 = vsel %vm435_vm2, %v921_v30, %v922_v27 }
 0x371   :  { %v932_v41 = vadd.f32 %v923_v39, %v912_v7  ;;  %v947_v6 = vadd.f32 %v944_v32, %v943_v33 }
 0x372   :  { %v946_v42 = vmul.f32 %v933_v37, %v933_v37 }
 0x373   :  { %v935_v3 = vadd.f32 %v934_v40, %v932_v41  ;;  %v945_v19 = vmul.f32 %v932_v41, %v932_v41 }
 0x375   :  { %v936_v43 = vadd.f32 %v935_v3, %v933_v37  ;;  %v948_v13 = vadd.f32 %v947_v6, %v945_v19 }
 0x377   :  { %v937_v44 = vrot.slane %v936_v43, 4  ;;  %v949_v45 = vadd.f32 %v948_v13, %v946_v42 }
 0x379   :  { %v938_v15 = vadd.f32 %v937_v44, %v936_v43  ;;  %v950_v46 = vrot.slane %v949_v45, 4 }
 0x37b   :  { %v939_v47 = vrot.slane %v938_v15, 2  ;;  %v951_v48 = vadd.f32 %v950_v46, %v949_v45 }
 0x37d   :  { %v940_v49 = vadd.f32 %v939_v47, %v938_v15  ;;  %v952_v50 = vrot.slane %v951_v48, 2 }
 0x37f   :  { %v941_v18 = vrot.slane %v940_v49, 1  ;;  %v953_v34 = vadd.f32 %v952_v50, %v951_v48 }
 0x381   :  { %v954_v51 = vrot.slane %v953_v34, 1  ;;  %v942_v21 = vadd.f32 %v941_v18, %v940_v49 }
 0x383   :  { %v955_v24 = vadd.f32 %v954_v51, %v953_v34 }
 0x385   :  { %v956_v28 = vsel %vm414_vm1, %v942_v21, %v955_v24 }
 0x386   :  { %1550 = vmatmul.mubr.f32.vlgmr.msra.gmra.mrb[10].mxu1 %v956_v28 }
 0x459   :  { %v1023_v52 = vpop.f32.mrb[10].mxu1 }
 0x45a   :  { %v1027_v53 = vmul.f32 0.001953125, %v1023_v52  ;;  %v1551_v55 = vpop.f32.mrb[11].mxu1 }
 0x45c   :  { %v1028_v31 = vmul.f32 %v1027_v53, %v1027_v53 }
 0x45e   :  { %v1030_v56 = vrot.slane %v1028_v31, 7 }
 0x460   :  { %v1032_v57 = vsub.f32 %v1027_v53, %v1030_v56 }
 0x462   :  { %v1033_v60 = vadd.f32 1e-05, %v1032_v57 }
 0x464   :  { %1804 = vrsqrt.f32 %v1033_v60 }
 0x46e   :  { %v1805_v61 = vpop.eup %1804 }
 0x46f   :  { %v1042_v14 = vmul.f32 %v1805_v61, %v1099_v35 }
 0x471   :  { %v1045_v62 = vrot.slane %v1042_v14, 1  ;;  %v1052_v38 = vrot.slane %v1042_v14, %v569_v5 }
 0x473   :  { %v1047_v1 = vmul.f32 %v1045_v62, %v1027_v53  ;;  %v1053_v4 = vmul.f32 %v1052_v38, %v930_v25  ;;  %v1054_v8 = vmul.f32 %v1052_v38, %v931_v20  ;;  %v1055_v9 = vmul.f32 %v1052_v38, %v932_v41 }
 0x474   :  { %v1056_v10 = vmul.f32 %v1052_v38, %v933_v37 }
 0x475   :  { %v1048_v2 = vsub.f32 %v1043_v63, %v1047_v1 }
 0x477   :  { %v1061_v7 = vrot.slane %v1048_v2, %v578_v11 }
 0x479   :  { %v1063_v12 = vadd.f32 %v1061_v7, %v1053_v4  ;;  %v1064_v16 = vadd.f32 %v1061_v7, %v1054_v8  ;;  %v1065_v17 = vadd.f32 %v1061_v7, %v1055_v9  ;;  %v1066_v22 = vadd.f32 %v1061_v7, %v1056_v10 }
 0x47b   :  { %v1067_v23 = vadd.f32 %v1063_v12, %v2053_v26  ;;  %v1068_v27 = vadd.f32 %v1064_v16, %v2057_v54  ;;  %v1069_v5 = vadd.f32 %v1065_v17, %v2059_v58  ;;  %v1070_v25 = vadd.f32 %v1066_v22, %v2063_v59 }
 0x47d   :  { %v1071_v29 = vmax.f32 %v1067_v23, 0.0  ;;  %v1072_v0 = vmax.f32 %v1068_v27, 0.0  ;;  %v1073_v11 = vmax.f32 %v1069_v5, 0.0  ;;  %v1074_v20 = vmax.f32 %v1070_v25, 0.0 }
 0x47f   :  { %1075 = vst [vmem:[#allocation10] sm:$0xff] %v1071_v29  ;;  %1076 = vst [vmem:[#allocation10 + $0x8] sm:$0xff] %v1072_v0 }
 0x480   :  { %1077 = vst [vmem:[#allocation10 + $0x10] sm:$0xff] %v1073_v11  ;;  %1078 = vst [vmem:[#allocation10 + $0x18] sm:$0xff] %v1074_v20 }
 0x481   :  { %1905 = shalt.err (!%p1902_p8)
}
 0x482   :  { %s1906_s20 = scalar_lea.hbm %s2218_s8, 512 }
 0x483   :  { %p1907_p9 = scmp.ne.s32.totalorder %s2218_s8, %s1906_s20  ;;  %p1910_p10 = scmp.lt.u32.totalorder %s1906_s20, %s2218_s8 }
 0x485   :  { %p1912_p11 = pnand %p1910_p10, %p1907_p9 }
 0x487   :  { %1915 = shalt.err (!%p1912_p11)
}
 0x488   :  { %1090 = dma.vmem_to_hbm [thread:$0]  %s1085_s15, 512, %s2218_s8, [#allocation4], %s1926_s17, %s1926_s17, %s1927_s18  }
 0x489   :  { %1922 = dma.done.wait [#allocation4], 512  }
 0x48a   :  { %1923 = vsyncadd [#allocation4], 4294966784 }
 0x48b   :  { %1094 = vsyncpa [#allocation3], 1 }
 0x48c   :  { %1095 = vsyncpa [#allocation6], 1 }
 0x48d   :  { %1096 = vsyncpa [#allocation9], 1 }
 0x48e   :  { %1097 = vsyncpa [#allocation4], 1 }

</bundles_post_ra>
